<compile_context>
chip_gen: v6e
topology: v6e:2x2x1
jax: 0.10.0
libtpu: 0.0.40
codegen_flags: <defaults>
</compile_context>

<pallas_src>
import jax
import jax.numpy as jnp
from jax import lax
from jax.experimental import pallas as pl
from jax.experimental.pallas import tpu as pltpu


def _round_up(x, m):
    return ((x + m - 1) // m) * m


def _cdiv(a, b):
    return -(-a // b)


def _vmem_capacity_bytes():
    """Per-core VMEM capacity; conservative fallback if the query is unavailable."""
    try:
        cap = getattr(pltpu.get_tpu_info(), "vmem_capacity_bytes", None)
        if cap:
            return int(cap)
    except Exception:
        pass
    return 64 << 20  # v7x per-TensorCore VMEM (smallest of the targets)


def _lane_multiple(dim):
    """128-lane multiple by default; 256 on v6e/v7x when the dim is already >128."""
    if dim <= 128:
        return 128
    try:
        kind = jax.devices()[0].device_kind.lower()
    except Exception:
        kind = ""
    return 256 if ("v6" in kind or "v7" in kind) else 128


def head_kernel(x_ref, w1_ref, b1_ref, w2_ref, b2_ref, o_ref):
    # x_ref:  (TN, D_pad)       block of token rows
    # w1_ref: (D_pad, H_pad)    first linear weight (transposed vs. PyTorch)
    # b1_ref: (1, H_pad)
    # w2_ref: (H_pad, C_pad)    second linear weight (transposed vs. PyTorch)
    # b2_ref: (1, C_pad)
    # o_ref:  (TN, C_pad)       lane-dense output slab

    # Linear 1 (MXU, native-dtype operands, f32 accumulate) + bias (f32).
    h = jnp.dot(x_ref[...], w1_ref[...], preferred_element_type=jnp.float32)
    h = h + b1_ref[...].astype(jnp.float32)

    # Exact GELU (matches torch.nn.GELU() default, erf formulation), f32 math.
    inv_sqrt2 = jnp.float32(0.7071067811865476)
    h = 0.5 * h * (1.0 + lax.erf(h * inv_sqrt2))

    # Dropout -> identity in eval mode.
    # TODO(synk): training-mode dropout not implemented.

    # Linear 2 (MXU) + bias.  Cast h to the weight dtype so MXU operand types match.
    out = jnp.dot(h.astype(w2_ref.dtype), w2_ref[...],
                  preferred_element_type=jnp.float32)
    out = out + b2_ref[...].astype(jnp.float32)

    o_ref[...] = out.astype(o_ref.dtype)


def head_forward(x, w1, b1, w2, b2, *, max_tile_n=1024, use_bf16_operands=False):
    """x: [N, D_in] -> [N, n_classes].

    w1: [D_in, H] (PyTorch weight.T), b1: [H] or [1, H]
    w2: [H, C]    (PyTorch weight.T), b2: [C] or [1, C]

    use_bf16_operands: feed bf16 operands to the MXU (f32 accumulation kept).
    Off by default since it slightly changes numerics; mainly a v5e throughput knob.
    """
    N, D_in = x.shape
    H = w1.shape[1]
    C = w2.shape[1]
    b1 = b1.reshape(1, H)
    b2 = b2.reshape(1, C)
    out_dtype = x.dtype

    # ---- lane-dense padding of hidden / classes (zeros keep the math exact) ----
    H_pad = _round_up(H, _lane_multiple(H))
    C_pad = _round_up(C, _lane_multiple(C))
    # Pad D_in to a 128 multiple only when it is ragged and not tiny (avoids a
    # wrapper copy of x when D_in is small, e.g. 32).
    D_pad = _round_up(D_in, 128) if (D_in % 128 != 0 and D_in >= 96) else D_in

    w1p = jnp.pad(w1, ((0, D_pad - D_in), (0, H_pad - H)))
    b1p = jnp.pad(b1, ((0, 0), (0, H_pad - H)))
    w2p = jnp.pad(w2, ((0, H_pad - H), (0, C_pad - C)))
    b2p = jnp.pad(b2, ((0, 0), (0, C_pad - C)))
    xq = jnp.pad(x, ((0, 0), (0, D_pad - D_in))) if D_pad != D_in else x

    if use_bf16_operands:
        xq = xq.astype(jnp.bfloat16)
        w1p = w1p.astype(jnp.bfloat16)
        w2p = w2p.astype(jnp.bfloat16)

    x_itemsize = jnp.dtype(xq.dtype).itemsize
    w_itemsize = jnp.dtype(w1p.dtype).itemsize

    # ---- VMEM budget (generation aware) and row tile size derived from it ----
    vmem_budget = (_vmem_capacity_bytes() * 3) // 4
    # Weights/biases: assume 2 buffers each for a safe estimate (1 when Buffered(1) sticks).
    weight_bytes = 2 * (D_pad * H_pad + H_pad + H_pad * C_pad + C_pad) * w_itemsize
    per_row_bytes = (2 * D_pad * x_itemsize          # x double buffer
                     + 2 * C_pad * x_itemsize        # out double buffer
                     + 3 * H_pad * 4 + 2 * C_pad * 4)  # f32 intermediates headroom
    tile_cap = (vmem_budget - weight_bytes - (4 << 20)) // per_row_bytes
    tile_n = max(8, min(max_tile_n, int(tile_cap)))
    # Give megacore (v7x) at least 2 grid steps to shard when N is large enough.
    if N >= 16:
        tile_n = min(tile_n, _cdiv(N, 2))
    tile_n = max(8, _round_up(min(tile_n, N), 8))
    grid_n = _cdiv(N, tile_n)  # ragged edge block handled by Pallas masking

    cost = pl.CostEstimate(
        flops=2 * N * (D_pad * H_pad + H_pad * C_pad),
        transcendentals=N * H_pad,
        bytes_accessed=(N * D_pad * x_itemsize + N * C_pad * x_itemsize
                        + (D_pad * H_pad + H_pad + H_pad * C_pad + C_pad) * w_itemsize),
    )

    def build_call(single_buffer_weights):
        wkw = {"pipeline_mode": pl.Buffered(1)} if single_buffer_weights else {}
        in_specs = [
            pl.BlockSpec((tile_n, D_pad), lambda i: (i, 0)),           # x rows (pipelined)
            pl.BlockSpec((D_pad, H_pad), lambda i: (0, 0), **wkw),     # W1 (grid-invariant)
            pl.BlockSpec((1, H_pad), lambda i: (0, 0), **wkw),         # b1
            pl.BlockSpec((H_pad, C_pad), lambda i: (0, 0), **wkw),     # W2 (grid-invariant)
            pl.BlockSpec((1, C_pad), lambda i: (0, 0), **wkw),         # b2
        ]
        return pl.pallas_call(
            head_kernel,
            out_shape=jax.ShapeDtypeStruct((N, C_pad), out_dtype),
            grid_spec=pltpu.PrefetchScalarGridSpec(
                num_scalar_prefetch=0,
                grid=(grid_n,),
                in_specs=in_specs,
                out_specs=pl.BlockSpec((tile_n, C_pad), lambda i: (i, 0)),
            ),
            compiler_params=pltpu.CompilerParams(
                dimension_semantics=("parallel",),
                vmem_limit_bytes=int(vmem_budget),
            ),
            cost_estimate=cost,
        )

    try:
        out = build_call(True)(xq, w1p, b1p, w2p, b2p)
    except Exception:
        # Fallback if single-buffered weight specs are rejected by this JAX version.
        out = build_call(False)(xq, w1p, b1p, w2p, b2p)

    return out if C_pad == C else out[:, :C]


def init_head_params(key, input_size, n_classes, hidden_size=64):
    """Deterministic synthetic parameters (shapes match the PyTorch module)."""
    k1, k2, k3, k4 = jax.random.split(key, 4)
    # Stored already transposed: [in, out]
    w1 = jax.random.normal(k1, (input_size, hidden_size), jnp.float32) * 0.05
    b1 = jax.random.normal(k2, (1, hidden_size), jnp.float32) * 0.05
    w2 = jax.random.normal(k3, (hidden_size, n_classes), jnp.float32) * 0.05
    b2 = jax.random.normal(k4, (1, n_classes), jnp.float32) * 0.05
    return w1, b1, w2, b2


if __name__ == "__main__":
    # Small shapes consistent with the module: tokens x input_size
    batch, seq = 2, 4
    input_size, hidden_size, n_classes = 32, 64, 16

    key = jax.random.PRNGKey(0)
    kx, kp = jax.random.split(key)

    x = jax.random.normal(kx, (batch, seq, input_size), jnp.float32)
    w1, b1, w2, b2 = init_head_params(kp, input_size, n_classes, hidden_size)

    # Flatten leading dims (Linear acts on the last axis), run kernel, reshape back.
    x2d = x.reshape(batch * seq, input_size)
    out2d = head_forward(x2d, w1, b1, w2, b2)
    out = out2d.reshape(batch, seq, n_classes)
    jax.block_until_ready(out)

    # Reference check in plain JAX (exact GELU, eval-mode dropout).
    ref = jnp.dot(x2d, w1) + b1
    ref = jax.nn.gelu(ref, approximate=False)
    ref = jnp.dot(ref, w2) + b2
    ref = ref.reshape(batch, seq, n_classes)
    assert jnp.allclose(out, ref, atol=1e-4, rtol=1e-4), "mismatch vs reference"

    print("KERNEL_OK")
</pallas_src>

<mosaic_0001>
module attributes {stable_mosaic.version = 11 : i64} {
  func.func @head_kernel(%arg0: i32, %arg1: memref<8x32xf32, #tpu.memory_space<vmem>>, %arg2: memref<32x128xf32, #tpu.memory_space<vmem>>, %arg3: memref<1x128xf32, #tpu.memory_space<vmem>>, %arg4: memref<128x128xf32, #tpu.memory_space<vmem>>, %arg5: memref<1x128xf32, #tpu.memory_space<vmem>>, %arg6: memref<8x128xf32, #tpu.memory_space<vmem>>) attributes {dimension_semantics = [#tpu.dimension_semantics<parallel>], iteration_bounds = array<i64: 1>, scalar_prefetch = 0 : i64, scratch_operands = 0 : i64, tpu.core_type = #tpu.core_type<tc>, window_params = [{transform_indices = @transform_0, window_bounds = array<i64: 8, 32>}, {pipeline_mode = #tpu.pipeline_mode<synchronous>, transform_indices = @transform_1, window_bounds = array<i64: 32, 128>}, {pipeline_mode = #tpu.pipeline_mode<synchronous>, transform_indices = @transform_2, window_bounds = array<i64: 1, 128>}, {pipeline_mode = #tpu.pipeline_mode<synchronous>, transform_indices = @transform_3, window_bounds = array<i64: 128, 128>}, {pipeline_mode = #tpu.pipeline_mode<synchronous>, transform_indices = @transform_4, window_bounds = array<i64: 1, 128>}, {transform_indices = @transform_5, window_bounds = array<i64: 8, 128>}]} {
    %c0 = arith.constant 0 : index
    %c0_0 = arith.constant 0 : index
    %0 = vector.load %arg1[%c0, %c0_0] : memref<8x32xf32, #tpu.memory_space<vmem>>, vector<8x32xf32>
    %c0_1 = arith.constant 0 : index
    %c0_2 = arith.constant 0 : index
    %1 = vector.load %arg2[%c0_1, %c0_2] : memref<32x128xf32, #tpu.memory_space<vmem>>, vector<32x128xf32>
    %cst = arith.constant dense<0.000000e+00> : vector<8x128xf32>
    %2 = tpu.matmul %0, %1, %cst {dimension_numbers = #tpu.dot_dimension_numbers<[1], [0], [0], [1], [0, 0, 1, 1], [], []>} : vector<8x32xf32>, vector<32x128xf32>, vector<8x128xf32> -> vector<8x128xf32>
    %c0_3 = arith.constant 0 : index
    %c0_4 = arith.constant 0 : index
    %3 = vector.load %arg3[%c0_3, %c0_4] : memref<1x128xf32, #tpu.memory_space<vmem>>, vector<1x128xf32>
    %4 = vector.broadcast %3 : vector<1x128xf32> to vector<8x128xf32>
    %5 = arith.addf %2, %4 : vector<8x128xf32>
    %cst_5 = arith.constant 5.000000e-01 : f32
    %6 = vector.broadcast %cst_5 : f32 to vector<8x128xf32>
    %7 = arith.mulf %6, %5 : vector<8x128xf32>
    %cst_6 = arith.constant 0.707106769 : f32
    %8 = vector.broadcast %cst_6 : f32 to vector<8x128xf32>
    %9 = arith.mulf %5, %8 : vector<8x128xf32>
    %10 = math.erf %9 : vector<8x128xf32>
    %cst_7 = arith.constant 1.000000e+00 : f32
    %11 = vector.broadcast %cst_7 : f32 to vector<8x128xf32>
    %12 = arith.addf %11, %10 : vector<8x128xf32>
    %13 = arith.mulf %7, %12 : vector<8x128xf32>
    %c0_8 = arith.constant 0 : index
    %c0_9 = arith.constant 0 : index
    %14 = vector.load %arg4[%c0_8, %c0_9] : memref<128x128xf32, #tpu.memory_space<vmem>>, vector<128x128xf32>
    %cst_10 = arith.constant dense<0.000000e+00> : vector<8x128xf32>
    %15 = tpu.matmul %13, %14, %cst_10 {dimension_numbers = #tpu.dot_dimension_numbers<[1], [0], [0], [1], [0, 0, 1, 1], [], []>} : vector<8x128xf32>, vector<128x128xf32>, vector<8x128xf32> -> vector<8x128xf32>
    %c0_11 = arith.constant 0 : index
    %c0_12 = arith.constant 0 : index
    %16 = vector.load %arg5[%c0_11, %c0_12] : memref<1x128xf32, #tpu.memory_space<vmem>>, vector<1x128xf32>
    %17 = vector.broadcast %16 : vector<1x128xf32> to vector<8x128xf32>
    %18 = arith.addf %15, %17 : vector<8x128xf32>
    %c0_13 = arith.constant 0 : index
    %c0_14 = arith.constant 0 : index
    %19 = vector.load %arg6[%c0_13, %c0_14] : memref<8x128xf32, #tpu.memory_space<vmem>>, vector<8x128xf32>
    tpu.vector_store %arg6[%c0_13, %c0_14], %18 {strides = array<i32>} : memref<8x128xf32, #tpu.memory_space<vmem>>, vector<8x128xf32>,
    return
  }
  func.func @transform_0(%arg0: i32) -> (i32, i32) {
    %c0_i32 = arith.constant 0 : i32
    %c0_i32_0 = arith.constant 0 : i32
    return %arg0, %c0_i32 : i32, i32
  }
  func.func @transform_1(%arg0: i32) -> (i32, i32) {
    %c0_i32 = arith.constant 0 : i32
    %c0_i32_0 = arith.constant 0 : i32
    %c0_i32_1 = arith.constant 0 : i32
    return %c0_i32, %c0_i32_0 : i32, i32
  }
  func.func @transform_2(%arg0: i32) -> (i32, i32) {
    %c0_i32 = arith.constant 0 : i32
    %c0_i32_0 = arith.constant 0 : i32
    %c0_i32_1 = arith.constant 0 : i32
    return %c0_i32, %c0_i32_0 : i32, i32
  }
  func.func @transform_3(%arg0: i32) -> (i32, i32) {
    %c0_i32 = arith.constant 0 : i32
    %c0_i32_0 = arith.constant 0 : i32
    %c0_i32_1 = arith.constant 0 : i32
    return %c0_i32, %c0_i32_0 : i32, i32
  }
  func.func @transform_4(%arg0: i32) -> (i32, i32) {
    %c0_i32 = arith.constant 0 : i32
    %c0_i32_0 = arith.constant 0 : i32
    %c0_i32_1 = arith.constant 0 : i32
    return %c0_i32, %c0_i32_0 : i32, i32
  }
  func.func @transform_5(%arg0: i32) -> (i32, i32) {
    %c0_i32 = arith.constant 0 : i32
    %c0_i32_0 = arith.constant 0 : i32
    return %arg0, %c0_i32 : i32, i32
  }
}

module attributes {stable_mosaic.version = 11 : i64} {
  func.func @head_kernel(%arg0: i32, %arg1: memref<8x32xf32, #tpu.memory_space<vmem>>, %arg2: memref<32x128xf32, #tpu.memory_space<vmem>>, %arg3: memref<1x128xf32, #tpu.memory_space<vmem>>, %arg4: memref<128x128xf32, #tpu.memory_space<vmem>>, %arg5: memref<1x128xf32, #tpu.memory_space<vmem>>, %arg6: memref<8x128xf32, #tpu.memory_space<vmem>>) attributes {dimension_semantics = [#tpu.dimension_semantics<parallel>], iteration_bounds = array<i64: 1>, scalar_prefetch = 0 : i64, scratch_operands = 0 : i64, tpu.core_type = #tpu.core_type<tc>, window_params = [{transform_indices = @transform_0, window_bounds = array<i64: 8, 32>}, {pipeline_mode = #tpu.pipeline_mode<synchronous>, transform_indices = @transform_1, window_bounds = array<i64: 32, 128>}, {pipeline_mode = #tpu.pipeline_mode<synchronous>, transform_indices = @transform_2, window_bounds = array<i64: 1, 128>}, {pipeline_mode = #tpu.pipeline_mode<synchronous>, transform_indices = @transform_3, window_bounds = array<i64: 128, 128>}, {pipeline_mode = #tpu.pipeline_mode<synchronous>, transform_indices = @transform_4, window_bounds = array<i64: 1, 128>}, {transform_indices = @transform_5, window_bounds = array<i64: 8, 128>}]} {
    %c0 = arith.constant 0 : index
    %c0_0 = arith.constant 0 : index
    %0 = vector.load %arg1[%c0, %c0_0] : memref<8x32xf32, #tpu.memory_space<vmem>>, vector<8x32xf32>
    %c0_1 = arith.constant 0 : index
    %c0_2 = arith.constant 0 : index
    %1 = vector.load %arg2[%c0_1, %c0_2] : memref<32x128xf32, #tpu.memory_space<vmem>>, vector<32x128xf32>
    %cst = arith.constant dense<0.000000e+00> : vector<8x128xf32>
    %2 = tpu.matmul %0, %1, %cst {dimension_numbers = #tpu.dot_dimension_numbers<[1], [0], [0], [1], [0, 0, 1, 1], [], []>} : vector<8x32xf32>, vector<32x128xf32>, vector<8x128xf32> -> vector<8x128xf32>
    %c0_3 = arith.constant 0 : index
    %c0_4 = arith.constant 0 : index
    %3 = vector.load %arg3[%c0_3, %c0_4] : memref<1x128xf32, #tpu.memory_space<vmem>>, vector<1x128xf32>
    %4 = vector.broadcast %3 : vector<1x128xf32> to vector<8x128xf32>
    %5 = arith.addf %2, %4 : vector<8x128xf32>
    %cst_5 = arith.constant 5.000000e-01 : f32
    %6 = vector.broadcast %cst_5 : f32 to vector<8x128xf32>
    %7 = arith.mulf %6, %5 : vector<8x128xf32>
    %cst_6 = arith.constant 0.707106769 : f32
    %8 = vector.broadcast %cst_6 : f32 to vector<8x128xf32>
    %9 = arith.mulf %5, %8 : vector<8x128xf32>
    %10 = math.erf %9 : vector<8x128xf32>
    %cst_7 = arith.constant 1.000000e+00 : f32
    %11 = vector.broadcast %cst_7 : f32 to vector<8x128xf32>
    %12 = arith.addf %11, %10 : vector<8x128xf32>
    %13 = arith.mulf %7, %12 : vector<8x128xf32>
    %c0_8 = arith.constant 0 : index
    %c0_9 = arith.constant 0 : index
    %14 = vector.load %arg4[%c0_8, %c0_9] : memref<128x128xf32, #tpu.memory_space<vmem>>, vector<128x128xf32>
    %cst_10 = arith.constant dense<0.000000e+00> : vector<8x128xf32>
    %15 = tpu.matmul %13, %14, %cst_10 {dimension_numbers = #tpu.dot_dimension_numbers<[1], [0], [0], [1], [0, 0, 1, 1], [], []>} : vector<8x128xf32>, vector<128x128xf32>, vector<8x128xf32> -> vector<8x128xf32>
    %c0_11 = arith.constant 0 : index
    %c0_12 = arith.constant 0 : index
    %16 = vector.load %arg5[%c0_11, %c0_12] : memref<1x128xf32, #tpu.memory_space<vmem>>, vector<1x128xf32>
    %17 = vector.broadcast %16 : vector<1x128xf32> to vector<8x128xf32>
    %18 = arith.addf %15, %17 : vector<8x128xf32>
    %c0_13 = arith.constant 0 : index
    %c0_14 = arith.constant 0 : index
    %19 = vector.load %arg6[%c0_13, %c0_14] : memref<8x128xf32, #tpu.memory_space<vmem>>, vector<8x128xf32>
    tpu.vector_store %arg6[%c0_13, %c0_14], %18 {strides = array<i32>} : memref<8x128xf32, #tpu.memory_space<vmem>>, vector<8x128xf32>,
    return
  }
  func.func @transform_0(%arg0: i32) -> (i32, i32) {
    %c0_i32 = arith.constant 0 : i32
    %c0_i32_0 = arith.constant 0 : i32
    return %arg0, %c0_i32 : i32, i32
  }
  func.func @transform_1(%arg0: i32) -> (i32, i32) {
    %c0_i32 = arith.constant 0 : i32
    %c0_i32_0 = arith.constant 0 : i32
    %c0_i32_1 = arith.constant 0 : i32
    return %c0_i32, %c0_i32_0 : i32, i32
  }
  func.func @transform_2(%arg0: i32) -> (i32, i32) {
    %c0_i32 = arith.constant 0 : i32
    %c0_i32_0 = arith.constant 0 : i32
    %c0_i32_1 = arith.constant 0 : i32
    return %c0_i32, %c0_i32_0 : i32, i32
  }
  func.func @transform_3(%arg0: i32) -> (i32, i32) {
    %c0_i32 = arith.constant 0 : i32
    %c0_i32_0 = arith.constant 0 : i32
    %c0_i32_1 = arith.constant 0 : i32
    return %c0_i32, %c0_i32_0 : i32, i32
  }
  func.func @transform_4(%arg0: i32) -> (i32, i32) {
    %c0_i32 = arith.constant 0 : i32
    %c0_i32_0 = arith.constant 0 : i32
    %c0_i32_1 = arith.constant 0 : i32
    return %c0_i32, %c0_i32_0 : i32, i32
  }
  func.func @transform_5(%arg0: i32) -> (i32, i32) {
    %c0_i32 = arith.constant 0 : i32
    %c0_i32_0 = arith.constant 0 : i32
    return %arg0, %c0_i32 : i32, i32
  }
}

</mosaic_0001>

<bundles_post_ra>
// kernel: tpu_custom_call.1
= control target key start
LH: loop header
LB: loop body
LE: loop exit
PB: predicated region body
PF: predicated region fallthrough
CT: control target
= control target key end

     0   :  { %10 = vsyncpa [#allocation3], 0  ;;  %s506_s0 = inlined_call_operand.hbm [shape: f32[8,32], index: 0, kind: input, shape index: {}]   ;;  %s507_s1 = inlined_call_operand.hbm [shape: f32[32,128], index: 1, kind: input, shape index: {}]   ;;  %s508_s2 = inlined_call_operand.vmem [shape: f32[1,128], index: 2, kind: input, shape index: {}]   ;;  %s509_s3 = inlined_call_operand.hbm [shape: f32[128,128], index: 3, kind: input, shape index: {}]   ;;  %s510_s4 = inlined_call_operand.vmem [shape: f32[1,128], index: 4, kind: input, shape index: {}]   ;;  %s511_s5 = inlined_call_operand.hbm [shape: f32[8,128], index: 5, kind: output, shape index: {}]  }
   0x1   :  { %11 = vsyncpa [#allocation6], 0 }
   0x2   :  { %12 = vsyncpa [#allocation4], 0  ;;  %s428_s18 = smov [#allocation5]  }
   0x3   :  { %s28_s19 = sshll.u32 %s428_s18, 4  ;;  %s29_s19 = int_to_ptr.vmem [resolvable:$true] %s28_s19 }
   0x4   :  { %s350_s20 = scalar_lea.vmem %s29_s19, 512  ;;  %p355_p1 = scmp.lt.s32.totalorder %s29_s19, %s29_s19 }
   0x5   :  { %p351_p0 = scmp.ne.s32.totalorder %s29_s19, %s350_s20  ;;  %p356_p2 = scmp.lt.s32.totalorder %s350_s20, %s350_s20 }
   0x7   :  { %p357_p3 = por %p356_p2, %p355_p1 }
   0x9   :  { %p358_p4 = pnand %p357_p3, %p351_p0 }
   0xb   :  { %361 = shalt.err (!%p358_p4)
}
   0xc   :  { %s429_s21 = smov 128   ;;  %s430_s22 = smov 8  }
   0xd   :  { %34 = dma.hbm_to_vmem [thread:$0]  %s507_s1, 512, %s29_s19, [#allocation6], %s429_s21, %s429_s21, %s430_s22  }
   0xe   :  { %s431_s25 = smov [#allocation2]   ;;  %s432_s27 = smov [#allocation7]  }
   0xf   :  { %s19_s26 = sshll.u32 %s431_s25, 4  ;;  %s42_s28 = sshll.u32 %s432_s27, 4  ;;  %s20_s26 = int_to_ptr.vmem [resolvable:$true] %s19_s26  ;;  %s43_s28 = int_to_ptr.vmem [resolvable:$true] %s42_s28 }
  0x10   :  { %s370_s29 = scalar_lea.vmem %s20_s26, 128  ;;  %p375_p6 = scmp.lt.s32.totalorder %s20_s26, %s20_s26 }
  0x11   :  { %p371_p5 = scmp.ne.s32.totalorder %s20_s26, %s370_s29  ;;  %p376_p7 = scmp.lt.s32.totalorder %s370_s29, %s370_s29 }
  0x13   :  { %p377_p8 = por %p376_p7, %p375_p6 }
  0x15   :  { %p378_p9 = pnand %p377_p8, %p371_p5 }
  0x17   :  { %381 = shalt.err (!%p378_p9)
}
  0x18   :  { %22 = dma.hbm_to_vmem [thread:$0]  %s506_s0, 128, %s20_s26, [#allocation3]  }
  0x19   :  { %s390_s7 = scalar_lea.vmem %s43_s28, 2048  ;;  %p395_p11 = scmp.lt.s32.totalorder %s43_s28, %s43_s28 }
  0x1a   :  { %p391_p10 = scmp.ne.s32.totalorder %s43_s28, %s390_s7  ;;  %p396_p12 = scmp.lt.s32.totalorder %s390_s7, %s390_s7 }
  0x1c   :  { %p397_p13 = por %p396_p12, %p395_p11 }
  0x1e   :  { %p398_p0 = pnand %p397_p13, %p391_p10 }
  0x20   :  { %401 = shalt.err (!%p398_p0)
}
  0x21   :  { %48 = dma.hbm_to_vmem [thread:$0]  %s509_s3, 2048, %s43_s28, [#allocation6], %s429_s21, %s429_s21, %s430_s22  }
  0x22   :  { %422 = dma.done.wait [#allocation3], 128  }
  0x23   :  { %423 = vsyncadd [#allocation3], 4294967168 }
  0x24   :  { %424 = dma.done.wait [#allocation6], 2560  }
  0x25   :  { %425 = vsyncadd [#allocation6], 4294964736  ;;  %v433_v0 = vmov 0.0   ;;  %vm434_vm0 = vmmov 0   ;;  %v64_v1 = vld [vmem:[#allocation5 + $0x18] sm:$0xff]  ;;  %v63_v2 = vld [vmem:[#allocation5 + $0x10] sm:$0xff] }
  0x26   :  { %286 = vmatprep.subr.mxu0 %v433_v0  ;;  %294 = vmatprep.mubr.msk.f32.mxu0 %vm434_vm0, %v433_v0  ;;  %v166_v3 = vld [vmem:[#allocation7 + $0x78] sm:$0xff]  ;;  %v62_v4 = vld [vmem:[#allocation5 + $0x8] sm:$0xff]  ;;  %v165_v5 = vld [vmem:[#allocation7 + $0x70] sm:$0xff]  ;;  %vm72_vm1 = vcmask 261120   ;;  %s435_s11 = smov [#allocation8]  }
  0x27   :  { %297 = vmatprep.subr.mxu1 %v433_v0  ;;  %329 = vmatprep.mubr.msk.f32.mxu1 %vm434_vm0, %v433_v0  ;;  %v164_v6 = vld [vmem:[#allocation7 + $0x68] sm:$0xff]  ;;  %v61_v7 = vld [vmem:[#allocation5] sm:$0xff]  ;;  %v60_v8 = vld [vmem:[#allocation2] sm:$0xff]  ;;  %s251_s12 = sshll.u32 %s435_s11, 4  ;;  %s252_s12 = int_to_ptr.vmem [resolvable:$true] %s251_s12 }
  0x28   :  { %287 = vmatpush3.msra.mxu0 %v64_v1  ;;  %298 = vmatpush3.msra.mxu1 %v166_v3  ;;  %v163_v9 = vld [vmem:[#allocation7 + $0x60] sm:$0xff]  ;;  %v162_v10 = vld [vmem:[#allocation7 + $0x58] sm:$0xff]  ;;  %v161_v11 = vld [vmem:[#allocation7 + $0x50] sm:$0xff]  ;;  %p407_p2 = scmp.lt.s32.totalorder %s252_s12, %s252_s12 }
  0x29   :  { %288 = vmatprep.subr.mxu0 %v433_v0  ;;  %299 = vmatprep.subr.mxu1 %v433_v0  ;;  %v160_v12 = vld [vmem:[#allocation7 + $0x48] sm:$0xff]  ;;  %v159_v13 = vld [vmem:[#allocation7 + $0x40] sm:$0xff]  ;;  %v158_v14 = vld [vmem:[#allocation7 + $0x38] sm:$0xff] }
  0x2a   :  { %289 = vmatpush3.msra.mxu0 %v63_v2  ;;  %300 = vmatpush3.msra.mxu1 %v165_v5  ;;  %v157_v15 = vld [vmem:[#allocation7 + $0x30] sm:$0xff]  ;;  %v156_v16 = vld [vmem:[#allocation7 + $0x28] sm:$0xff]  ;;  %v155_v17 = vld [vmem:[#allocation7 + $0x20] sm:$0xff] }
  0x2b   :  { %290 = vmatprep.subr.mxu0 %v433_v0  ;;  %301 = vmatprep.subr.mxu1 %v433_v0  ;;  %v154_v18 = vld [vmem:[#allocation7 + $0x18] sm:$0xff]  ;;  %v153_v19 = vld [vmem:[#allocation7 + $0x10] sm:$0xff]  ;;  %v152_v20 = vld [vmem:[#allocation7 + $0x8] sm:$0xff] }
  0x2c   :  { %291 = vmatpush3.msra.mxu0 %v62_v4  ;;  %302 = vmatpush3.msra.mxu1 %v164_v6  ;;  %v151_v21 = vld [vmem:[#allocation7] sm:$0xff]  ;;  %v261_v22 = vld [vmem:[%s508_s2] ss:$0 sm:$0xff]  ;;  %s402_s2 = scalar_lea.vmem %s252_s12, 128 }
  0x2d   :  { %292 = vmatprep.subr.mxu0 %v433_v0  ;;  %303 = vmatprep.subr.mxu1 %v433_v0  ;;  %v263_v31 = vld [vmem:[%s510_s4] ss:$0 sm:$0xff]  ;;  %p403_p1 = scmp.ne.s32.totalorder %s252_s12, %s402_s2  ;;  %p408_p3 = scmp.lt.s32.totalorder %s402_s2, %s402_s2 }
  0x2e   :  { %293 = vmatpush3.msra.mxu0 %v61_v7  ;;  %304 = vmatpush3.msra.mxu1 %v163_v9 }
  0x2f   :  { %295 = vmatmul.mubr.msk.f32.vlgmr.msra.gmra.mxu0 %vm72_vm1, %v60_v8  ;;  %305 = vmatprep.subr.mxu1 %v433_v0  ;;  %p409_p4 = por %p408_p3, %p407_p2 }
  0x30   :  { %306 = vmatpush3.msra.mxu1 %v162_v10 }
  0x31   :  { %307 = vmatprep.subr.mxu1 %v433_v0  ;;  %p410_p5 = pnand %p409_p4, %p403_p1 }
  0x32   :  { %308 = vmatpush3.msra.mxu1 %v161_v11 }
  0x33   :  { %309 = vmatprep.subr.mxu1 %v433_v0 }
  0x34   :  { %310 = vmatpush3.msra.mxu1 %v160_v12 }
  0x35   :  { %311 = vmatprep.subr.mxu1 %v433_v0 }
  0x36   :  { %312 = vmatpush3.msra.mxu1 %v159_v13 }
  0x37   :  { %313 = vmatprep.subr.mxu1 %v433_v0 }
  0x38   :  { %314 = vmatpush3.msra.mxu1 %v158_v14 }
  0x39   :  { %315 = vmatprep.subr.mxu1 %v433_v0 }
  0x3a   :  { %316 = vmatpush3.msra.mxu1 %v157_v15 }
  0x3b   :  { %317 = vmatprep.subr.mxu1 %v433_v0 }
  0x3c   :  { %318 = vmatpush3.msra.mxu1 %v156_v16 }
  0x3d   :  { %319 = vmatprep.subr.mxu1 %v433_v0 }
  0x3e   :  { %320 = vmatpush3.msra.mxu1 %v155_v17 }
  0x3f   :  { %321 = vmatprep.subr.mxu1 %v433_v0 }
  0x40   :  { %322 = vmatpush3.msra.mxu1 %v154_v18 }
  0x41   :  { %323 = vmatprep.subr.mxu1 %v433_v0 }
  0x42   :  { %324 = vmatpush3.msra.mxu1 %v153_v19 }
  0x43   :  { %325 = vmatprep.subr.mxu1 %v433_v0 }
  0x44   :  { %326 = vmatpush3.msra.mxu1 %v152_v20 }
  0x45   :  { %327 = vmatprep.subr.mxu1 %v433_v0 }
  0x46   :  { %328 = vmatpush3.msra.mxu1 %v151_v21 }
  0xef   :  { %v142_v23 = vpop.f32.mrf.mxu0 }
  0xf0   :  { %v143_v24 = vadd.f32 %v261_v22, %v142_v23 }
  0xf1   :  { %v296_v25 = vpop.f32.mrf.mxu0 }
  0xf2   :  { %v147_v26 = vmul.f32 0.70710677, %v143_v24  ;;  %v146_v28 = vmul.f32 0.5, %v143_v24 }
  0xf4   :  { %340 = verf.f32 %v147_v26 }
 0x101   :  { %v341_v27 = vpop.eup %340 }
 0x102   :  { %v149_v29 = vadd.f32 1.0, %v341_v27 }
 0x104   :  { %v150_v30 = vmul.f32 %v149_v29, %v146_v28 }
 0x106   :  { %330 = vmatmul.mubr.f32.vlgmr.msra.gmra.mxu1 %v150_v30 }
 0x1c6   :  { %v240_v32 = vpop.f32.mrf.mxu1 }
 0x1c7   :  { %v241_v33 = vadd.f32 %v263_v31, %v240_v32 }
 0x1c8   :  { %v331_v34 = vpop.f32.mrf.mxu1 }
 0x1c9   :  { %244 = vst [vmem:[#allocation8] sm:$0xff] %v241_v33 }
 0x1ca   :  { %413 = shalt.err (!%p410_p5)
}
 0x1cb   :  { %254 = dma.vmem_to_hbm [thread:$0]  %s252_s12, 128, %s511_s5, [#allocation4]  }
 0x1cc   :  { %426 = dma.done.wait [#allocation4], 128  }
 0x1cd   :  { %427 = vsyncadd [#allocation4], 4294967168 }
 0x1ce   :  { %258 = vsyncpa [#allocation3], 1 }
 0x1cf   :  { %259 = vsyncpa [#allocation6], 1 }
 0x1d0   :  { %260 = vsyncpa [#allocation4], 1 }

// kernel: tpu_custom_call.1
= control target key start
LH: loop header
LB: loop body
LE: loop exit
PB: predicated region body
PF: predicated region fallthrough
CT: control target
= control target key end

     0   :  { %10 = vsyncpa [#allocation3], 0  ;;  %s506_s0 = inlined_call_operand.hbm [shape: f32[8,32], index: 0, kind: input, shape index: {}]   ;;  %s507_s1 = inlined_call_operand.hbm [shape: f32[32,128], index: 1, kind: input, shape index: {}]   ;;  %s508_s2 = inlined_call_operand.vmem [shape: f32[1,128], index: 2, kind: input, shape index: {}]   ;;  %s509_s3 = inlined_call_operand.hbm [shape: f32[128,128], index: 3, kind: input, shape index: {}]   ;;  %s510_s4 = inlined_call_operand.vmem [shape: f32[1,128], index: 4, kind: input, shape index: {}]   ;;  %s511_s5 = inlined_call_operand.hbm [shape: f32[8,128], index: 5, kind: output, shape index: {}]  }
   0x1   :  { %11 = vsyncpa [#allocation6], 0 }
   0x2   :  { %12 = vsyncpa [#allocation4], 0  ;;  %s428_s18 = smov [#allocation5]  }
   0x3   :  { %s28_s19 = sshll.u32 %s428_s18, 4  ;;  %s29_s19 = int_to_ptr.vmem [resolvable:$true] %s28_s19 }
   0x4   :  { %s350_s20 = scalar_lea.vmem %s29_s19, 512  ;;  %p355_p1 = scmp.lt.s32.totalorder %s29_s19, %s29_s19 }
   0x5   :  { %p351_p0 = scmp.ne.s32.totalorder %s29_s19, %s350_s20  ;;  %p356_p2 = scmp.lt.s32.totalorder %s350_s20, %s350_s20 }
   0x7   :  { %p357_p3 = por %p356_p2, %p355_p1 }
   0x9   :  { %p358_p4 = pnand %p357_p3, %p351_p0 }
   0xb   :  { %361 = shalt.err (!%p358_p4)
}
   0xc   :  { %s429_s21 = smov 128   ;;  %s430_s22 = smov 8  }
   0xd   :  { %34 = dma.hbm_to_vmem [thread:$0]  %s507_s1, 512, %s29_s19, [#allocation6], %s429_s21, %s429_s21, %s430_s22  }
   0xe   :  { %s431_s25 = smov [#allocation2]   ;;  %s432_s27 = smov [#allocation7]  }
   0xf   :  { %s19_s26 = sshll.u32 %s431_s25, 4  ;;  %s42_s28 = sshll.u32 %s432_s27, 4  ;;  %s20_s26 = int_to_ptr.vmem [resolvable:$true] %s19_s26  ;;  %s43_s28 = int_to_ptr.vmem [resolvable:$true] %s42_s28 }
  0x10   :  { %s370_s29 = scalar_lea.vmem %s20_s26, 128  ;;  %p375_p6 = scmp.lt.s32.totalorder %s20_s26, %s20_s26 }
  0x11   :  { %p371_p5 = scmp.ne.s32.totalorder %s20_s26, %s370_s29  ;;  %p376_p7 = scmp.lt.s32.totalorder %s370_s29, %s370_s29 }
  0x13   :  { %p377_p8 = por %p376_p7, %p375_p6 }
  0x15   :  { %p378_p9 = pnand %p377_p8, %p371_p5 }
  0x17   :  { %381 = shalt.err (!%p378_p9)
}
  0x18   :  { %22 = dma.hbm_to_vmem [thread:$0]  %s506_s0, 128, %s20_s26, [#allocation3]  }
  0x19   :  { %s390_s7 = scalar_lea.vmem %s43_s28, 2048  ;;  %p395_p11 = scmp.lt.s32.totalorder %s43_s28, %s43_s28 }
  0x1a   :  { %p391_p10 = scmp.ne.s32.totalorder %s43_s28, %s390_s7  ;;  %p396_p12 = scmp.lt.s32.totalorder %s390_s7, %s390_s7 }
  0x1c   :  { %p397_p13 = por %p396_p12, %p395_p11 }
  0x1e   :  { %p398_p0 = pnand %p397_p13, %p391_p10 }
  0x20   :  { %401 = shalt.err (!%p398_p0)
}
  0x21   :  { %48 = dma.hbm_to_vmem [thread:$0]  %s509_s3, 2048, %s43_s28, [#allocation6], %s429_s21, %s429_s21, %s430_s22  }
  0x22   :  { %422 = dma.done.wait [#allocation3], 128  }
  0x23   :  { %423 = vsyncadd [#allocation3], 4294967168 }
  0x24   :  { %424 = dma.done.wait [#allocation6], 2560  }
  0x25   :  { %425 = vsyncadd [#allocation6], 4294964736  ;;  %v433_v0 = vmov 0.0   ;;  %vm434_vm0 = vmmov 0   ;;  %v64_v1 = vld [vmem:[#allocation5 + $0x18] sm:$0xff]  ;;  %v63_v2 = vld [vmem:[#allocation5 + $0x10] sm:$0xff] }
  0x26   :  { %286 = vmatprep.subr.mxu0 %v433_v0  ;;  %294 = vmatprep.mubr.msk.f32.mxu0 %vm434_vm0, %v433_v0  ;;  %v166_v3 = vld [vmem:[#allocation7 + $0x78] sm:$0xff]  ;;  %v62_v4 = vld [vmem:[#allocation5 + $0x8] sm:$0xff]  ;;  %v165_v5 = vld [vmem:[#allocation7 + $0x70] sm:$0xff]  ;;  %vm72_vm1 = vcmask 261120   ;;  %s435_s11 = smov [#allocation8]  }
  0x27   :  { %297 = vmatprep.subr.mxu1 %v433_v0  ;;  %329 = vmatprep.mubr.msk.f32.mxu1 %vm434_vm0, %v433_v0  ;;  %v164_v6 = vld [vmem:[#allocation7 + $0x68] sm:$0xff]  ;;  %v61_v7 = vld [vmem:[#allocation5] sm:$0xff]  ;;  %v60_v8 = vld [vmem:[#allocation2] sm:$0xff]  ;;  %s251_s12 = sshll.u32 %s435_s11, 4  ;;  %s252_s12 = int_to_ptr.vmem [resolvable:$true] %s251_s12 }
  0x28   :  { %287 = vmatpush3.msra.mxu0 %v64_v1  ;;  %298 = vmatpush3.msra.mxu1 %v166_v3  ;;  %v163_v9 = vld [vmem:[#allocation7 + $0x60] sm:$0xff]  ;;  %v162_v10 = vld [vmem:[#allocation7 + $0x58] sm:$0xff]  ;;  %v161_v11 = vld [vmem:[#allocation7 + $0x50] sm:$0xff]  ;;  %p407_p2 = scmp.lt.s32.totalorder %s252_s12, %s252_s12 }
  0x29   :  { %288 = vmatprep.subr.mxu0 %v433_v0  ;;  %299 = vmatprep.subr.mxu1 %v433_v0  ;;  %v160_v12 = vld [vmem:[#allocation7 + $0x48] sm:$0xff]  ;;  %v159_v13 = vld [vmem:[#allocation7 + $0x40] sm:$0xff]  ;;  %v158_v14 = vld [vmem:[#allocation7 + $0x38] sm:$0xff] }
  0x2a   :  { %289 = vmatpush3.msra.mxu0 %v63_v2  ;;  %300 = vmatpush3.msra.mxu1 %v165_v5  ;;  %v157_v15 = vld [vmem:[#allocation7 + $0x30] sm:$0xff]  ;;  %v156_v16 = vld [vmem:[#allocation7 + $0x28] sm:$0xff]  ;;  %v155_v17 = vld [vmem:[#allocation7 + $0x20] sm:$0xff] }
  0x2b   :  { %290 = vmatprep.subr.mxu0 %v433_v0  ;;  %301 = vmatprep.subr.mxu1 %v433_v0  ;;  %v154_v18 = vld [vmem:[#allocation7 + $0x18] sm:$0xff]  ;;  %v153_v19 = vld [vmem:[#allocation7 + $0x10] sm:$0xff]  ;;  %v152_v20 = vld [vmem:[#allocation7 + $0x8] sm:$0xff] }
  0x2c   :  { %291 = vmatpush3.msra.mxu0 %v62_v4  ;;  %302 = vmatpush3.msra.mxu1 %v164_v6  ;;  %v151_v21 = vld [vmem:[#allocation7] sm:$0xff]  ;;  %v261_v22 = vld [vmem:[%s508_s2] ss:$0 sm:$0xff]  ;;  %s402_s2 = scalar_lea.vmem %s252_s12, 128 }
  0x2d   :  { %292 = vmatprep.subr.mxu0 %v433_v0  ;;  %303 = vmatprep.subr.mxu1 %v433_v0  ;;  %v263_v31 = vld [vmem:[%s510_s4] ss:$0 sm:$0xff]  ;;  %p403_p1 = scmp.ne.s32.totalorder %s252_s12, %s402_s2  ;;  %p408_p3 = scmp.lt.s32.totalorder %s402_s2, %s402_s2 }
  0x2e   :  { %293 = vmatpush3.msra.mxu0 %v61_v7  ;;  %304 = vmatpush3.msra.mxu1 %v163_v9 }
  0x2f   :  { %295 = vmatmul.mubr.msk.f32.vlgmr.msra.gmra.mxu0 %vm72_vm1, %v60_v8  ;;  %305 = vmatprep.subr.mxu1 %v433_v0  ;;  %p409_p4 = por %p408_p3, %p407_p2 }
  0x30   :  { %306 = vmatpush3.msra.mxu1 %v162_v10 }
  0x31   :  { %307 = vmatprep.subr.mxu1 %v433_v0  ;;  %p410_p5 = pnand %p409_p4, %p403_p1 }
  0x32   :  { %308 = vmatpush3.msra.mxu1 %v161_v11 }
  0x33   :  { %309 = vmatprep.subr.mxu1 %v433_v0 }
  0x34   :  { %310 = vmatpush3.msra.mxu1 %v160_v12 }
  0x35   :  { %311 = vmatprep.subr.mxu1 %v433_v0 }
  0x36   :  { %312 = vmatpush3.msra.mxu1 %v159_v13 }
  0x37   :  { %313 = vmatprep.subr.mxu1 %v433_v0 }
  0x38   :  { %314 = vmatpush3.msra.mxu1 %v158_v14 }
  0x39   :  { %315 = vmatprep.subr.mxu1 %v433_v0 }
  0x3a   :  { %316 = vmatpush3.msra.mxu1 %v157_v15 }
  0x3b   :  { %317 = vmatprep.subr.mxu1 %v433_v0 }
  0x3c   :  { %318 = vmatpush3.msra.mxu1 %v156_v16 }
  0x3d   :  { %319 = vmatprep.subr.mxu1 %v433_v0 }
  0x3e   :  { %320 = vmatpush3.msra.mxu1 %v155_v17 }
  0x3f   :  { %321 = vmatprep.subr.mxu1 %v433_v0 }
  0x40   :  { %322 = vmatpush3.msra.mxu1 %v154_v18 }
  0x41   :  { %323 = vmatprep.subr.mxu1 %v433_v0 }
  0x42   :  { %324 = vmatpush3.msra.mxu1 %v153_v19 }
  0x43   :  { %325 = vmatprep.subr.mxu1 %v433_v0 }
  0x44   :  { %326 = vmatpush3.msra.mxu1 %v152_v20 }
  0x45   :  { %327 = vmatprep.subr.mxu1 %v433_v0 }
  0x46   :  { %328 = vmatpush3.msra.mxu1 %v151_v21 }
  0xef   :  { %v142_v23 = vpop.f32.mrf.mxu0 }
  0xf0   :  { %v143_v24 = vadd.f32 %v261_v22, %v142_v23 }
  0xf1   :  { %v296_v25 = vpop.f32.mrf.mxu0 }
  0xf2   :  { %v147_v26 = vmul.f32 0.70710677, %v143_v24  ;;  %v146_v28 = vmul.f32 0.5, %v143_v24 }
  0xf4   :  { %340 = verf.f32 %v147_v26 }
 0x101   :  { %v341_v27 = vpop.eup %340 }
 0x102   :  { %v149_v29 = vadd.f32 1.0, %v341_v27 }
 0x104   :  { %v150_v30 = vmul.f32 %v149_v29, %v146_v28 }
 0x106   :  { %330 = vmatmul.mubr.f32.vlgmr.msra.gmra.mxu1 %v150_v30 }
 0x1c6   :  { %v240_v32 = vpop.f32.mrf.mxu1 }
 0x1c7   :  { %v241_v33 = vadd.f32 %v263_v31, %v240_v32 }
 0x1c8   :  { %v331_v34 = vpop.f32.mrf.mxu1 }
 0x1c9   :  { %244 = vst [vmem:[#allocation8] sm:$0xff] %v241_v33 }
 0x1ca   :  { %413 = shalt.err (!%p410_p5)
}
 0x1cb   :  { %254 = dma.vmem_to_hbm [thread:$0]  %s252_s12, 128, %s511_s5, [#allocation4]  }
 0x1cc   :  { %426 = dma.done.wait [#allocation4], 128  }
 0x1cd   :  { %427 = vsyncadd [#allocation4], 4294967168 }
 0x1ce   :  { %258 = vsyncpa [#allocation3], 1 }
 0x1cf   :  { %259 = vsyncpa [#allocation6], 1 }
 0x1d0   :  { %260 = vsyncpa [#allocation4], 1 }

</bundles_post_ra>
